<compile_context>
chip_gen: v7x
topology: tpu7x:2x2x1
jax: 0.10.0
libtpu: 0.0.40
codegen_flags: <defaults>
</compile_context>

<pallas_src>
import functools

import jax
import jax.numpy as jnp
from jax.experimental import pallas as pl
from jax.experimental.pallas import tpu as pltpu


def _pwce_kernel(cw_ref, logits_ref, tgt_ref, w_ref, o_ref, *,
                 per_class_w, n_rows, ragged):
    """One grid step: (C, rows, 128) batch-0 logits tile -> (8,128) partial sum."""
    _, C, ROWS, LANE = logits_ref.shape
    N = tgt_ref.shape[0]

    # Running max over the class axis (leading dim -> full-vreg VPU maxes).
    m = logits_ref[0, 0].astype(jnp.float32)
    for c in range(1, C):
        m = jnp.maximum(m, logits_ref[0, c].astype(jnp.float32))

    # Single fused pass over classes: sum-of-exp, OR-of-batches one-hot,
    # s1 = sum_c cw*w*oh*z and s2 = sum_c cw*w*oh.
    se = jnp.zeros((ROWS, LANE), jnp.float32)
    s1 = jnp.zeros((ROWS, LANE), jnp.float32)
    s2 = jnp.zeros((ROWS, LANE), jnp.float32)
    for c in range(C):
        z_c = logits_ref[0, c].astype(jnp.float32) - m
        se = se + jnp.exp(z_c)                         # EUP
        oh = tgt_ref[0] == c                           # bool one-hot, OR over batches
        for j in range(1, N):
            oh = jnp.logical_or(oh, tgt_ref[j] == c)
        cw_c = cw_ref[c]                               # scalar class weight from SMEM
        if per_class_w:                                # N == C: per-class pixel weights
            m_c = jnp.where(oh, cw_c * w_ref[c].astype(jnp.float32), 0.0)
        else:                                          # N == 1: weight factored out below
            m_c = jnp.where(oh, cw_c, 0.0)
        s1 = s1 + m_c * z_c
        s2 = s2 + m_c

    lse = jnp.log(se)                                  # log-sum-exp per spatial position
    contrib = s1 - lse * s2                            # == sum_c cw*w*oh*logp
    if not per_class_w:
        contrib = contrib * w_ref[0].astype(jnp.float32)

    if ragged:                                         # mask rows past the true extent
        row0 = pl.program_id(0) * ROWS
        rows = row0 + jax.lax.broadcasted_iota(jnp.int32, (ROWS, 1), 0)
        contrib = jnp.where(rows < n_rows, contrib, 0.0)

    # (ROWS,128) -> (8,128) with full-vreg VPU adds; cross-lane finish is in JAX.
    o_ref[0] = contrib.reshape(ROWS // 8, 8, LANE).sum(axis=0)


def _round_up(x, m):
    return -(-x // m) * m


def pixel_wise_cross_entropy_loss(logits, target, weights, class_weights=None, *,
                                  rows_per_tile=512):
    """logits: (N,C,D,H,W) f32/bf16, target: (N,D,H,W) int, weights: (N,D,H,W)."""
    N, C, D, H, W = logits.shape
    assert target.shape == (N, D, H, W)
    assert weights.shape == target.shape
    S = D * H * W
    LANE = 128

    per_class_w = N != 1
    if per_class_w:
        # weights.unsqueeze(0).expand_as(input) in the reference needs N==1 or N==C
        assert N == C, "reference weight broadcast requires N == 1 or N == C"

    if class_weights is None:
        class_weights = jnp.ones((C,), jnp.float32)
    class_weights = jnp.asarray(class_weights, jnp.float32).reshape(C)

    target = target.astype(jnp.int32)
    logits_f = logits.reshape(N, C, S)          # free reshapes, no HBM copy
    weights_f = weights.reshape(N, S)
    target_f = target.reshape(N, S)

    if S % LANE:
        # TODO(synk): mask a ragged lane tail in-kernel instead of this pad copy.
        pad = LANE - S % LANE
        logits_f = jnp.pad(logits_f, ((0, 0), (0, 0), (0, pad)))       # finite -> safe
        weights_f = jnp.pad(weights_f, ((0, 0), (0, pad)))             # zero weight
        target_f = jnp.pad(target_f, ((0, 0), (0, pad)), constant_values=-1)

    R = logits_f.shape[-1] // LANE
    logits_r = logits_f.reshape(N, C, R, LANE)
    weights_r = weights_f.reshape(N, R, LANE)
    target_r = target_f.reshape(N, R, LANE)

    # Sublane granularity: 8 rows for 32-bit inputs, 16 for 16-bit (bf16 packing).
    sub = 16 if (jnp.dtype(logits.dtype).itemsize == 2
                 or jnp.dtype(weights.dtype).itemsize == 2) else 8
    rows_per_tile = min(_round_up(rows_per_tile, sub), _round_up(R, sub))
    T = pl.cdiv(R, rows_per_tile)
    ragged = T * rows_per_tile != R

    kernel = functools.partial(_pwce_kernel, per_class_w=per_class_w,
                               n_rows=R, ragged=ragged)
    w_block = (C, rows_per_tile, LANE) if per_class_w else (1, rows_per_tile, LANE)

    partials = pl.pallas_call(
        kernel,
        out_shape=jax.ShapeDtypeStruct((T, 8, LANE), jnp.float32),
        grid=(T,),
        in_specs=[
            pl.BlockSpec(memory_space=pltpu.MemorySpace.SMEM),                 # class weights (C,)
            pl.BlockSpec((1, C, rows_per_tile, LANE), lambda t: (0, 0, t, 0)),  # batch-0 logits tile
            pl.BlockSpec((N, rows_per_tile, LANE), lambda t: (0, t, 0)),        # labels, all batches
            pl.BlockSpec(w_block, lambda t: (0, t, 0)),                         # pixel weights
        ],
        out_specs=pl.BlockSpec((1, 8, LANE), lambda t: (t, 0, 0)),              # per-tile partial
        compiler_params=pltpu.CompilerParams(dimension_semantics=("parallel",)),
    )(class_weights, logits_r, target_r, weights_r)

    total = N * C * D * H * W                           # mean denominator
    return -jnp.sum(partials) / total


def _reference_loss(logits, target, weights, class_weights):
    """Pure-JAX re-statement of the PyTorch forward (ignore_index=None)."""
    N, C, D, H, W = logits.shape
    logp = jax.nn.log_softmax(logits.astype(jnp.float32), axis=1)
    cls = jnp.arange(C, dtype=target.dtype).reshape(C, 1, 1, 1)
    oh0 = jnp.zeros((C, D, H, W), jnp.float32)
    for j in range(N):
        oh0 = jnp.maximum(oh0, (target[j][None] == cls).astype(jnp.float32))
    onehot = jnp.zeros((N, C, D, H, W), jnp.float32).at[0].set(oh0)
    if N == 1:
        w_exp = jnp.broadcast_to(weights[0][None, None].astype(jnp.float32),
                                 (N, C, D, H, W))
    else:
        w_exp = jnp.broadcast_to(weights[None].astype(jnp.float32),
                                 (N, C, D, H, W))
    cw = class_weights.reshape(1, C, 1, 1, 1)
    return jnp.mean(-cw * w_exp * onehot * logp)


if __name__ == "__main__":
    key = jax.random.PRNGKey(0)
    k1, k2, k3, k4, k5, k6 = jax.random.split(key, 6)

    # Case 1: N == C (per-class pixel-weight path), f32, multi-tile grid.
    N, C, D, H, W = 4, 4, 8, 16, 16                    # S = 2048 -> R = 16 lane rows
    logits = jax.random.normal(k1, (N, C, D, H, W), jnp.float32)
    target = jax.random.randint(k2, (N, D, H, W), 0, C, jnp.int32)
    weights = jax.random.uniform(k3, (N, D, H, W), jnp.float32)
    class_weights = 0.5 + 0.25 * jnp.arange(C, dtype=jnp.float32)

    loss = pixel_wise_cross_entropy_loss(logits, target, weights, class_weights,
                                         rows_per_tile=8)
    loss = jax.block_until_ready(loss)
    ref = _reference_loss(logits, target, weights, class_weights)
    assert jnp.allclose(loss, ref, rtol=1e-4, atol=1e-6), (loss, ref)

    # Case 2: N == 1 (broadcast pixel weights), bf16 inputs read as-is,
    # ragged last row tile exercises the in-kernel mask.
    N2, C2, D2, H2, W2 = 1, 3, 24, 8, 16               # S = 3072 -> R = 24, tiles of 16
    logits2 = jax.random.normal(k4, (N2, C2, D2, H2, W2), jnp.float32).astype(jnp.bfloat16)
    target2 = jax.random.randint(k5, (N2, D2, H2, W2), 0, C2, jnp.int32)
    weights2 = jax.random.uniform(k6, (N2, D2, H2, W2), jnp.float32).astype(jnp.bfloat16)

    loss2 = pixel_wise_cross_entropy_loss(logits2, target2, weights2, None,
                                          rows_per_tile=16)
    loss2 = jax.block_until_ready(loss2)
    ref2 = _reference_loss(logits2, target2, weights2, jnp.ones((C2,), jnp.float32))
    assert jnp.allclose(loss2, ref2, rtol=1e-4, atol=1e-6), (loss2, ref2)

    print("KERNEL_OK")
</pallas_src>

<mosaic_0001>
module attributes {stable_mosaic.version = 11 : i64} {
  func.func @_pwce_kernel(%arg0: i32, %arg1: memref<4xf32, #tpu.memory_space<smem>>, %arg2: memref<1x4x8x128xf32, #tpu.memory_space<vmem>>, %arg3: memref<4x8x128xi32, #tpu.memory_space<vmem>>, %arg4: memref<4x8x128xf32, #tpu.memory_space<vmem>>, %arg5: memref<1x8x128xf32, #tpu.memory_space<vmem>>) attributes {dimension_semantics = [#tpu.dimension_semantics<parallel>], iteration_bounds = array<i64: 2>, scalar_prefetch = 0 : i64, scratch_operands = 0 : i64, tpu.core_type = #tpu.core_type<tc>, window_params = [{transform_indices = @transform_0, window_bounds = array<i64: 4>}, {transform_indices = @transform_1, window_bounds = array<i64: 1, 4, 8, 128>}, {transform_indices = @transform_2, window_bounds = array<i64: 4, 8, 128>}, {transform_indices = @transform_3, window_bounds = array<i64: 4, 8, 128>}, {transform_indices = @transform_4, window_bounds = array<i64: 1, 8, 128>}]} {
    %c0 = arith.constant 0 : index
    %c0_0 = arith.constant 0 : index
    %c0_1 = arith.constant 0 : index
    %c0_2 = arith.constant 0 : index
    %0 = vector.load %arg2[%c0, %c0_0, %c0_1, %c0_2] : memref<1x4x8x128xf32, #tpu.memory_space<vmem>>, vector<1x1x8x128xf32>
    %1 = vector.shape_cast %0 : vector<1x1x8x128xf32> to vector<8x128xf32>
    %c0_3 = arith.constant 0 : index
    %c1 = arith.constant 1 : index
    %c0_4 = arith.constant 0 : index
    %c0_5 = arith.constant 0 : index
    %2 = vector.load %arg2[%c0_3, %c1, %c0_4, %c0_5] : memref<1x4x8x128xf32, #tpu.memory_space<vmem>>, vector<1x1x8x128xf32>
    %3 = vector.shape_cast %2 : vector<1x1x8x128xf32> to vector<8x128xf32>
    %4 = arith.maximumf %1, %3 : vector<8x128xf32>
    %c0_6 = arith.constant 0 : index
    %c2 = arith.constant 2 : index
    %c0_7 = arith.constant 0 : index
    %c0_8 = arith.constant 0 : index
    %5 = vector.load %arg2[%c0_6, %c2, %c0_7, %c0_8] : memref<1x4x8x128xf32, #tpu.memory_space<vmem>>, vector<1x1x8x128xf32>
    %6 = vector.shape_cast %5 : vector<1x1x8x128xf32> to vector<8x128xf32>
    %7 = arith.maximumf %4, %6 : vector<8x128xf32>
    %c0_9 = arith.constant 0 : index
    %c3 = arith.constant 3 : index
    %c0_10 = arith.constant 0 : index
    %c0_11 = arith.constant 0 : index
    %8 = vector.load %arg2[%c0_9, %c3, %c0_10, %c0_11] : memref<1x4x8x128xf32, #tpu.memory_space<vmem>>, vector<1x1x8x128xf32>
    %9 = vector.shape_cast %8 : vector<1x1x8x128xf32> to vector<8x128xf32>
    %10 = arith.maximumf %7, %9 : vector<8x128xf32>
    %cst = arith.constant 0.000000e+00 : f32
    %11 = vector.broadcast %cst : f32 to vector<8x128xf32>
    %cst_12 = arith.constant 0.000000e+00 : f32
    %12 = vector.broadcast %cst_12 : f32 to vector<8x128xf32>
    %cst_13 = arith.constant 0.000000e+00 : f32
    %13 = vector.broadcast %cst_13 : f32 to vector<8x128xf32>
    %c0_14 = arith.constant 0 : index
    %c0_15 = arith.constant 0 : index
    %c0_16 = arith.constant 0 : index
    %c0_17 = arith.constant 0 : index
    %14 = vector.load %arg2[%c0_14, %c0_15, %c0_16, %c0_17] : memref<1x4x8x128xf32, #tpu.memory_space<vmem>>, vector<1x1x8x128xf32>
    %15 = vector.shape_cast %14 : vector<1x1x8x128xf32> to vector<8x128xf32>
    %16 = arith.subf %15, %10 : vector<8x128xf32>
    %17 = math.exp %16 : vector<8x128xf32>
    %18 = arith.addf %11, %17 : vector<8x128xf32>
    %c0_18 = arith.constant 0 : index
    %c0_19 = arith.constant 0 : index
    %c0_20 = arith.constant 0 : index
    %19 = vector.load %arg3[%c0_18, %c0_19, %c0_20] : memref<4x8x128xi32, #tpu.memory_space<vmem>>, vector<1x8x128xi32>
    %20 = vector.shape_cast %19 : vector<1x8x128xi32> to vector<8x128xi32>
    %c0_i32 = arith.constant 0 : i32
    %21 = vector.broadcast %c0_i32 : i32 to vector<8x128xi32>
    %22 = arith.cmpi eq, %20, %21 : vector<8x128xi32>
    %c1_21 = arith.constant 1 : index
    %c0_22 = arith.constant 0 : index
    %c0_23 = arith.constant 0 : index
    %23 = vector.load %arg3[%c1_21, %c0_22, %c0_23] : memref<4x8x128xi32, #tpu.memory_space<vmem>>, vector<1x8x128xi32>
    %24 = vector.shape_cast %23 : vector<1x8x128xi32> to vector<8x128xi32>
    %c0_i32_24 = arith.constant 0 : i32
    %25 = vector.broadcast %c0_i32_24 : i32 to vector<8x128xi32>
    %26 = arith.cmpi eq, %24, %25 : vector<8x128xi32>
    %27 = arith.ori %22, %26 : vector<8x128xi1>
    %c2_25 = arith.constant 2 : index
    %c0_26 = arith.constant 0 : index
    %c0_27 = arith.constant 0 : index
    %28 = vector.load %arg3[%c2_25, %c0_26, %c0_27] : memref<4x8x128xi32, #tpu.memory_space<vmem>>, vector<1x8x128xi32>
    %29 = vector.shape_cast %28 : vector<1x8x128xi32> to vector<8x128xi32>
    %c0_i32_28 = arith.constant 0 : i32
    %30 = vector.broadcast %c0_i32_28 : i32 to vector<8x128xi32>
    %31 = arith.cmpi eq, %29, %30 : vector<8x128xi32>
    %32 = arith.ori %27, %31 : vector<8x128xi1>
    %c3_29 = arith.constant 3 : index
    %c0_30 = arith.constant 0 : index
    %c0_31 = arith.constant 0 : index
    %33 = vector.load %arg3[%c3_29, %c0_30, %c0_31] : memref<4x8x128xi32, #tpu.memory_space<vmem>>, vector<1x8x128xi32>
    %34 = vector.shape_cast %33 : vector<1x8x128xi32> to vector<8x128xi32>
    %c0_i32_32 = arith.constant 0 : i32
    %35 = vector.broadcast %c0_i32_32 : i32 to vector<8x128xi32>
    %36 = arith.cmpi eq, %34, %35 : vector<8x128xi32>
    %37 = arith.ori %32, %36 : vector<8x128xi1>
    %c0_33 = arith.constant 0 : index
    %38 = memref.load %arg1[%c0_33] : memref<4xf32, #tpu.memory_space<smem>>
    %c0_34 = arith.constant 0 : index
    %c0_35 = arith.constant 0 : index
    %c0_36 = arith.constant 0 : index
    %39 = vector.load %arg4[%c0_34, %c0_35, %c0_36] : memref<4x8x128xf32, #tpu.memory_space<vmem>>, vector<1x8x128xf32>
    %40 = vector.shape_cast %39 : vector<1x8x128xf32> to vector<8x128xf32>
    %41 = vector.broadcast %38 : f32 to vector<8x128xf32>
    %42 = arith.mulf %41, %40 : vector<8x128xf32>
    %cst_37 = arith.constant 0.000000e+00 : f32
    %43 = vector.broadcast %cst_37 : f32 to vector<8x128xf32>
    %44 = arith.select %37, %42, %43 : vector<8x128xi1>, vector<8x128xf32>
    %45 = arith.mulf %44, %16 : vector<8x128xf32>
    %46 = arith.addf %12, %45 : vector<8x128xf32>
    %47 = arith.addf %13, %44 : vector<8x128xf32>
    %c0_38 = arith.constant 0 : index
    %c1_39 = arith.constant 1 : index
    %c0_40 = arith.constant 0 : index
    %c0_41 = arith.constant 0 : index
    %48 = vector.load %arg2[%c0_38, %c1_39, %c0_40, %c0_41] : memref<1x4x8x128xf32, #tpu.memory_space<vmem>>, vector<1x1x8x128xf32>
    %49 = vector.shape_cast %48 : vector<1x1x8x128xf32> to vector<8x128xf32>
    %50 = arith.subf %49, %10 : vector<8x128xf32>
    %51 = math.exp %50 : vector<8x128xf32>
    %52 = arith.addf %18, %51 : vector<8x128xf32>
    %c0_42 = arith.constant 0 : index
    %c0_43 = arith.constant 0 : index
    %c0_44 = arith.constant 0 : index
    %53 = vector.load %arg3[%c0_42, %c0_43, %c0_44] : memref<4x8x128xi32, #tpu.memory_space<vmem>>, vector<1x8x128xi32>
    %54 = vector.shape_cast %53 : vector<1x8x128xi32> to vector<8x128xi32>
    %c1_i32 = arith.constant 1 : i32
    %55 = vector.broadcast %c1_i32 : i32 to vector<8x128xi32>
    %56 = arith.cmpi eq, %54, %55 : vector<8x128xi32>
    %c1_45 = arith.constant 1 : index
    %c0_46 = arith.constant 0 : index
    %c0_47 = arith.constant 0 : index
    %57 = vector.load %arg3[%c1_45, %c0_46, %c0_47] : memref<4x8x128xi32, #tpu.memory_space<vmem>>, vector<1x8x128xi32>
    %58 = vector.shape_cast %57 : vector<1x8x128xi32> to vector<8x128xi32>
    %c1_i32_48 = arith.constant 1 : i32
    %59 = vector.broadcast %c1_i32_48 : i32 to vector<8x128xi32>
    %60 = arith.cmpi eq, %58, %59 : vector<8x128xi32>
    %61 = arith.ori %56, %60 : vector<8x128xi1>
    %c2_49 = arith.constant 2 : index
    %c0_50 = arith.constant 0 : index
    %c0_51 = arith.constant 0 : index
    %62 = vector.load %arg3[%c2_49, %c0_50, %c0_51] : memref<4x8x128xi32, #tpu.memory_space<vmem>>, vector<1x8x128xi32>
    %63 = vector.shape_cast %62 : vector<1x8x128xi32> to vector<8x128xi32>
    %c1_i32_52 = arith.constant 1 : i32
    %64 = vector.broadcast %c1_i32_52 : i32 to vector<8x128xi32>
    %65 = arith.cmpi eq, %63, %64 : vector<8x128xi32>
    %66 = arith.ori %61, %65 : vector<8x128xi1>
    %c3_53 = arith.constant 3 : index
    %c0_54 = arith.constant 0 : index
    %c0_55 = arith.constant 0 : index
    %67 = vector.load %arg3[%c3_53, %c0_54, %c0_55] : memref<4x8x128xi32, #tpu.memory_space<vmem>>, vector<1x8x128xi32>
    %68 = vector.shape_cast %67 : vector<1x8x128xi32> to vector<8x128xi32>
    %c1_i32_56 = arith.constant 1 : i32
    %69 = vector.broadcast %c1_i32_56 : i32 to vector<8x128xi32>
    %70 = arith.cmpi eq, %68, %69 : vector<8x128xi32>
    %71 = arith.ori %66, %70 : vector<8x128xi1>
    %c1_57 = arith.constant 1 : index
    %72 = memref.load %arg1[%c1_57] : memref<4xf32, #tpu.memory_space<smem>>
    %c1_58 = arith.constant 1 : index
    %c0_59 = arith.constant 0 : index
    %c0_60 = arith.constant 0 : index
    %73 = vector.load %arg4[%c1_58, %c0_59, %c0_60] : memref<4x8x128xf32, #tpu.memory_space<vmem>>, vector<1x8x128xf32>
    %74 = vector.shape_cast %73 : vector<1x8x128xf32> to vector<8x128xf32>
    %75 = vector.broadcast %72 : f32 to vector<8x128xf32>
    %76 = arith.mulf %75, %74 : vector<8x128xf32>
    %cst_61 = arith.constant 0.000000e+00 : f32
    %77 = vector.broadcast %cst_61 : f32 to vector<8x128xf32>
    %78 = arith.select %71, %76, %77 : vector<8x128xi1>, vector<8x128xf32>
    %79 = arith.mulf %78, %50 : vector<8x128xf32>
    %80 = arith.addf %46, %79 : vector<8x128xf32>
    %81 = arith.addf %47, %78 : vector<8x128xf32>
    %c0_62 = arith.constant 0 : index
    %c2_63 = arith.constant 2 : index
    %c0_64 = arith.constant 0 : index
    %c0_65 = arith.constant 0 : index
    %82 = vector.load %arg2[%c0_62, %c2_63, %c0_64, %c0_65] : memref<1x4x8x128xf32, #tpu.memory_space<vmem>>, vector<1x1x8x128xf32>
    %83 = vector.shape_cast %82 : vector<1x1x8x128xf32> to vector<8x128xf32>
    %84 = arith.subf %83, %10 : vector<8x128xf32>
    %85 = math.exp %84 : vector<8x128xf32>
    %86 = arith.addf %52, %85 : vector<8x128xf32>
    %c0_66 = arith.constant 0 : index
    %c0_67 = arith.constant 0 : index
    %c0_68 = arith.constant 0 : index
    %87 = vector.load %arg3[%c0_66, %c0_67, %c0_68] : memref<4x8x128xi32, #tpu.memory_space<vmem>>, vector<1x8x128xi32>
    %88 = vector.shape_cast %87 : vector<1x8x128xi32> to vector<8x128xi32>
    %c2_i32 = arith.constant 2 : i32
    %89 = vector.broadcast %c2_i32 : i32 to vector<8x128xi32>
    %90 = arith.cmpi eq, %88, %89 : vector<8x128xi32>
    %c1_69 = arith.constant 1 : index
    %c0_70 = arith.constant 0 : index
    %c0_71 = arith.constant 0 : index
    %91 = vector.load %arg3[%c1_69, %c0_70, %c0_71] : memref<4x8x128xi32, #tpu.memory_space<vmem>>, vector<1x8x128xi32>
    %92 = vector.shape_cast %91 : vector<1x8x128xi32> to vector<8x128xi32>
    %c2_i32_72 = arith.constant 2 : i32
    %93 = vector.broadcast %c2_i32_72 : i32 to vector<8x128xi32>
    %94 = arith.cmpi eq, %92, %93 : vector<8x128xi32>
    %95 = arith.ori %90, %94 : vector<8x128xi1>
    %c2_73 = arith.constant 2 : index
    %c0_74 = arith.constant 0 : index
    %c0_75 = arith.constant 0 : index
    %96 = vector.load %arg3[%c2_73, %c0_74, %c0_75] : memref<4x8x128xi32, #tpu.memory_space<vmem>>, vector<1x8x128xi32>
    %97 = vector.shape_cast %96 : vector<1x8x128xi32> to vector<8x128xi32>
    %c2_i32_76 = arith.constant 2 : i32
    %98 = vector.broadcast %c2_i32_76 : i32 to vector<8x128xi32>
    %99 = arith.cmpi eq, %97, %98 : vector<8x128xi32>
    %100 = arith.ori %95, %99 : vector<8x128xi1>
    %c3_77 = arith.constant 3 : index
    %c0_78 = arith.constant 0 : index
    %c0_79 = arith.constant 0 : index
    %101 = vector.load %arg3[%c3_77, %c0_78, %c0_79] : memref<4x8x128xi32, #tpu.memory_space<vmem>>, vector<1x8x128xi32>
    %102 = vector.shape_cast %101 : vector<1x8x128xi32> to vector<8x128xi32>
    %c2_i32_80 = arith.constant 2 : i32
    %103 = vector.broadcast %c2_i32_80 : i32 to vector<8x128xi32>
    %104 = arith.cmpi eq, %102, %103 : vector<8x128xi32>
    %105 = arith.ori %100, %104 : vector<8x128xi1>
    %c2_81 = arith.constant 2 : index
    %106 = memref.load %arg1[%c2_81] : memref<4xf32, #tpu.memory_space<smem>>
    %c2_82 = arith.constant 2 : index
    %c0_83 = arith.constant 0 : index
    %c0_84 = arith.constant 0 : index
    %107 = vector.load %arg4[%c2_82, %c0_83, %c0_84] : memref<4x8x128xf32, #tpu.memory_space<vmem>>, vector<1x8x128xf32>
    %108 = vector.shape_cast %107 : vector<1x8x128xf32> to vector<8x128xf32>
    %109 = vector.broadcast %106 : f32 to vector<8x128xf32>
    %110 = arith.mulf %109, %108 : vector<8x128xf32>
    %cst_85 = arith.constant 0.000000e+00 : f32
    %111 = vector.broadcast %cst_85 : f32 to vector<8x128xf32>
    %112 = arith.select %105, %110, %111 : vector<8x128xi1>, vector<8x128xf32>
    %113 = arith.mulf %112, %84 : vector<8x128xf32>
    %114 = arith.addf %80, %113 : vector<8x128xf32>
    %115 = arith.addf %81, %112 : vector<8x128xf32>
    %c0_86 = arith.constant 0 : index
    %c3_87 = arith.constant 3 : index
    %c0_88 = arith.constant 0 : index
    %c0_89 = arith.constant 0 : index
    %116 = vector.load %arg2[%c0_86, %c3_87, %c0_88, %c0_89] : memref<1x4x8x128xf32, #tpu.memory_space<vmem>>, vector<1x1x8x128xf32>
    %117 = vector.shape_cast %116 : vector<1x1x8x128xf32> to vector<8x128xf32>
    %118 = arith.subf %117, %10 : vector<8x128xf32>
    %119 = math.exp %118 : vector<8x128xf32>
    %120 = arith.addf %86, %119 : vector<8x128xf32>
    %c0_90 = arith.constant 0 : index
    %c0_91 = arith.constant 0 : index
    %c0_92 = arith.constant 0 : index
    %121 = vector.load %arg3[%c0_90, %c0_91, %c0_92] : memref<4x8x128xi32, #tpu.memory_space<vmem>>, vector<1x8x128xi32>
    %122 = vector.shape_cast %121 : vector<1x8x128xi32> to vector<8x128xi32>
    %c3_i32 = arith.constant 3 : i32
    %123 = vector.broadcast %c3_i32 : i32 to vector<8x128xi32>
    %124 = arith.cmpi eq, %122, %123 : vector<8x128xi32>
    %c1_93 = arith.constant 1 : index
    %c0_94 = arith.constant 0 : index
    %c0_95 = arith.constant 0 : index
    %125 = vector.load %arg3[%c1_93, %c0_94, %c0_95] : memref<4x8x128xi32, #tpu.memory_space<vmem>>, vector<1x8x128xi32>
    %126 = vector.shape_cast %125 : vector<1x8x128xi32> to vector<8x128xi32>
    %c3_i32_96 = arith.constant 3 : i32
    %127 = vector.broadcast %c3_i32_96 : i32 to vector<8x128xi32>
    %128 = arith.cmpi eq, %126, %127 : vector<8x128xi32>
    %129 = arith.ori %124, %128 : vector<8x128xi1>
    %c2_97 = arith.constant 2 : index
    %c0_98 = arith.constant 0 : index
    %c0_99 = arith.constant 0 : index
    %130 = vector.load %arg3[%c2_97, %c0_98, %c0_99] : memref<4x8x128xi32, #tpu.memory_space<vmem>>, vector<1x8x128xi32>
    %131 = vector.shape_cast %130 : vector<1x8x128xi32> to vector<8x128xi32>
    %c3_i32_100 = arith.constant 3 : i32
    %132 = vector.broadcast %c3_i32_100 : i32 to vector<8x128xi32>
    %133 = arith.cmpi eq, %131, %132 : vector<8x128xi32>
    %134 = arith.ori %129, %133 : vector<8x128xi1>
    %c3_101 = arith.constant 3 : index
    %c0_102 = arith.constant 0 : index
    %c0_103 = arith.constant 0 : index
    %135 = vector.load %arg3[%c3_101, %c0_102, %c0_103] : memref<4x8x128xi32, #tpu.memory_space<vmem>>, vector<1x8x128xi32>
    %136 = vector.shape_cast %135 : vector<1x8x128xi32> to vector<8x128xi32>
    %c3_i32_104 = arith.constant 3 : i32
    %137 = vector.broadcast %c3_i32_104 : i32 to vector<8x128xi32>
    %138 = arith.cmpi eq, %136, %137 : vector<8x128xi32>
    %139 = arith.ori %134, %138 : vector<8x128xi1>
    %c3_105 = arith.constant 3 : index
    %140 = memref.load %arg1[%c3_105] : memref<4xf32, #tpu.memory_space<smem>>
    %c3_106 = arith.constant 3 : index
    %c0_107 = arith.constant 0 : index
    %c0_108 = arith.constant 0 : index
    %141 = vector.load %arg4[%c3_106, %c0_107, %c0_108] : memref<4x8x128xf32, #tpu.memory_space<vmem>>, vector<1x8x128xf32>
    %142 = vector.shape_cast %141 : vector<1x8x128xf32> to vector<8x128xf32>
    %143 = vector.broadcast %140 : f32 to vector<8x128xf32>
    %144 = arith.mulf %143, %142 : vector<8x128xf32>
    %cst_109 = arith.constant 0.000000e+00 : f32
    %145 = vector.broadcast %cst_109 : f32 to vector<8x128xf32>
    %146 = arith.select %139, %144, %145 : vector<8x128xi1>, vector<8x128xf32>
    %147 = arith.mulf %146, %118 : vector<8x128xf32>
    %148 = arith.addf %114, %147 : vector<8x128xf32>
    %149 = arith.addf %115, %146 : vector<8x128xf32>
    %150 = math.log %120 : vector<8x128xf32>
    %151 = arith.mulf %150, %149 : vector<8x128xf32>
    %152 = arith.subf %148, %151 : vector<8x128xf32>
    %153 = vector.shape_cast %152 : vector<8x128xf32> to vector<1x8x128xf32>
    %cst_110 = arith.constant dense<0.000000e+00> : vector<8x128xf32>
    %154 = vector.multi_reduction <add>, %153, %cst_110 [0] : vector<1x8x128xf32> to vector<8x128xf32>
    %c0_111 = arith.constant 0 : index
    %c0_112 = arith.constant 0 : index
    %c0_113 = arith.constant 0 : index
    %155 = vector.load %arg5[%c0_111, %c0_112, %c0_113] : memref<1x8x128xf32, #tpu.memory_space<vmem>>, vector<1x8x128xf32>
    %156 = vector.shape_cast %155 : vector<1x8x128xf32> to vector<8x128xf32>
    %157 = vector.shape_cast %154 : vector<8x128xf32> to vector<1x8x128xf32>
    tpu.vector_store %arg5[%c0_111, %c0_112, %c0_113], %157 {strides = array<i32>} : memref<1x8x128xf32, #tpu.memory_space<vmem>>, vector<1x8x128xf32>,
    return
  }
  func.func @transform_0(%arg0: i32) -> i32 {
    %c0_i32 = arith.constant 0 : i32
    %c0_i32_0 = arith.constant 0 : i32
    return %c0_i32 : i32
  }
  func.func @transform_1(%arg0: i32) -> (i32, i32, i32, i32) {
    %c0_i32 = arith.constant 0 : i32
    %c0_i32_0 = arith.constant 0 : i32
    %c0_i32_1 = arith.constant 0 : i32
    %c0_i32_2 = arith.constant 0 : i32
    return %c0_i32, %c0_i32_0, %arg0, %c0_i32_1 : i32, i32, i32, i32
  }
  func.func @transform_2(%arg0: i32) -> (i32, i32, i32) {
    %c0_i32 = arith.constant 0 : i32
    %c0_i32_0 = arith.constant 0 : i32
    %c0_i32_1 = arith.constant 0 : i32
    return %c0_i32, %arg0, %c0_i32_0 : i32, i32, i32
  }
  func.func @transform_3(%arg0: i32) -> (i32, i32, i32) {
    %c0_i32 = arith.constant 0 : i32
    %c0_i32_0 = arith.constant 0 : i32
    %c0_i32_1 = arith.constant 0 : i32
    return %c0_i32, %arg0, %c0_i32_0 : i32, i32, i32
  }
  func.func @transform_4(%arg0: i32) -> (i32, i32, i32) {
    %c0_i32 = arith.constant 0 : i32
    %c0_i32_0 = arith.constant 0 : i32
    %c0_i32_1 = arith.constant 0 : i32
    return %arg0, %c0_i32, %c0_i32_0 : i32, i32, i32
  }
}

</mosaic_0001>

<bundles_post_ra>
// kernel: tpu_custom_call.1
= control target key start
LH: loop header
LB: loop body
LE: loop exit
PB: predicated region body
PF: predicated region fallthrough
CT: control target
= control target key end

     0   :  { %s1201_s0 = inlined_call_operand.hbm [shape: f32[4], index: 0, kind: input, shape index: {}]   ;;  %s1202_s1 = inlined_call_operand.hbm [shape: f32[4,4,16,128], index: 1, kind: input, shape index: {}]   ;;  %s1203_s2 = inlined_call_operand.hbm [shape: s32[4,16,128], index: 2, kind: input, shape index: {}]   ;;  %s1204_s3 = inlined_call_operand.hbm [shape: f32[4,16,128], index: 3, kind: input, shape index: {}]   ;;  %s1205_s4 = inlined_call_operand.hbm [shape: f32[2,8,128], index: 4, kind: output, shape index: {}]  }
   0x1   :  { %1222 = sst [smem:[#allocation19_spill]] %s1202_s1 }
   0x2   :  { %1223 = sst [smem:[#allocation20_spill]] %s1203_s2 }
   0x3   :  { %9 = vsyncpa [#allocation5], 0 }
   0x4   :  { %10 = vsyncpa [#allocation3], 0 }
   0x5   :  { %12 = vsyncpa [#allocation3 + $0x1], 0 }
   0x6   :  { %13 = vsyncpa [#allocation8], 0 }
   0x7   :  { %15 = vsyncpa [#allocation8 + $0x1], 0 }
   0x8   :  { %16 = vsyncpa [#allocation4], 0 }
   0x9   :  { %18 = vsyncpa [#allocation4 + $0x1], 0  ;;  %s867_s15 = smov 0   ;;  %s869_s16 = smov 0  }
   0xa   :  { %s871_s17 = smov 0   ;;  %s873_s18 = smov 0  }
   0xb LB: > { %1224 = sst [smem:[#allocation15_spill]] %s828_s17  ;;  %s888_s19 = sadd.s32 1, %s832_s18   ;;  %s832_s18 = sphi %s873_s18, %s1252_s18   ;;  %s828_s17 = sphi %s871_s17, %s1254_s17   ;;  %s824_s16 = sphi %s869_s16, %s1256_s16   ;;  %s820_s15 = sphi %s867_s15, %s1255_s15  }
   0xc   : > { %1225 = sst [smem:[#allocation16_spill]] %s832_s18  ;;  %s52_s20 = sadd.s32 1, %s828_s17 }
   0xd   : > { %1226 = sst [smem:[#allocation17_spill]] %s888_s19  ;;  %s49_s21 = ssub.s32 %s832_s18, %s888_s19 }
   0xe   : > { %p1206_p0 = scmp.ne.s32.totalorder %s828_s17, %s824_s16  ;;  %p50_p1 = scmp.eq.s32.totalorder %s49_s21, 0 }
   0xf   : > { %p60_p2 = scmp.eq.s32.totalorder %s832_s18, 0  ;;  %p606_p4 = scmp.lt.s32.totalorder %s832_s18, 2 }
  0x10   : > { %s899_s22 = scalar_select %p50_p1, %s828_s17, %s52_s20  }
  0x11   : > { %p61_p5 = por %p60_p2, %p1206_p0  ;;  %s176_s23 = sand.u32 1, %s828_s17  }
  0x12   : > { %1227 = sst [smem:[#allocation18_spill]] %s899_s22  ;;  %s907_s24 = sshll.u32 %s176_s23, 5 }
  0x13   : > { %s910_s25 = sshll.u32 %s832_s18, 7  ;;  %p912_p6 = pnand %p606_p4, %p61_p5 }
  0x14   : > { %s196_s27 = sand.u32 1, %s832_s18   ;;  %s1229_s2 = sld [smem:[#allocation20_spill]] }
  0x15   : > { %s200_s5 = scalar_lea.vmem [#allocation7], %s907_s24  ;;  %s926_s7 = scalar_lea.sflag [#allocation8], %s196_s27 }
  0x16   : > { %s206_s6 = sshll.u32 %s200_s5, 4  ;;  %p932_p8 = pneg %p912_p6  ;;  %s924_s6 = int_to_ptr.vmem [resolvable:$true] %s206_s6 }
  0x1a   : > { %s921_s30 = scalar_lea.hbm %s1229_s2, %s910_s25  ;;  %s660_s12 = scalar_lea.hbm %s1229_s2, 1024 }
  0x1b   : > { %s655_s8 = scalar_lea.hbm %s921_s30, 512  ;;  %p661_p11 = scmp.lt.u32.totalorder %s921_s30, %s1229_s2 }
  0x1c   : > { %p656_p7 = scmp.ne.s32.totalorder %s921_s30, %s655_s8  ;;  %p662_p12 = scmp.lt.u32.totalorder %s660_s12, %s655_s8 }
  0x1d   : > { %p664_p1 = scmp.lt.u32.totalorder %s655_s8, %s921_s30 }
  0x1e   : > { %p658_p9 = pnand %p932_p8, %p656_p7  ;;  %p663_p13 = por %p662_p12, %p661_p11 }
  0x20   : > { %p659_p10 = pneg %p658_p9  ;;  %p665_p2 = por %p664_p1, %p663_p13 }
  0x22   : > { %p666_p4 = pnand %p665_p2, %p659_p10 }
  0x24   : > { %669 = shalt.err (!%p666_p4)
}
  0x25   : > { %s670_s20 = scalar_lea.vmem %s924_s6, 512  ;;  %s834_s21 = smov [#allocation7]  }
  0x26   : > { %p671_p5 = scmp.ne.s32.totalorder %s924_s6, %s670_s20  ;;  %s675_s27 = sshll.u32 %s834_s21, 4  ;;  %s676_s27 = int_to_ptr.vmem [resolvable:$false] %s675_s27 }
  0x27   : > { %s677_s28 = scalar_lea.vmem %s676_s27, 1024  ;;  %p678_p3 = scmp.lt.s32.totalorder %s924_s6, %s676_s27 }
  0x28   : > { %p673_p7 = pnand %p671_p5, %p932_p8  ;;  %p679_p0 = scmp.lt.s32.totalorder %s677_s28, %s670_s20 }
  0x2a   : > { %p674_p9 = pneg %p673_p7  ;;  %p680_p11 = por %p679_p0, %p678_p3 }
  0x2c   : > { %p681_p12 = pnand %p680_p11, %p674_p9 }
  0x2e   : > { %684 = shalt.err (!%p681_p12)
}
  0x2f   : > { %s1207_s29 = smov 256   ;;  %s1209_s5 = smov 128  }
  0x30   : > { %s1211_s8 = smov 8   ;;  %s960_s10 = sadd.s32 4294967295, %s832_s18  }
  0x31   : > { %597 = dma.hbm_to_vmem [thread:$0]  (!%p912_p6), %s921_s30, 512, %s924_s6, %s926_s7, %s1207_s29, %s1209_s5, %s1211_s8  }
  0x32   : > { %s543_s11 = sadd.s32 4294967294, %s832_s18   ;;  %p65_p0 = scmp.ne.s32.totalorder %s824_s16, %s820_s15 }
  0x33   : > { %p1216_p3 = scmp.eq.s32.totalorder %s960_s10, 0  ;;  %p141_p10 = scmp.eq.s32.totalorder %s960_s10, 1 }
  0x34   : > { %p147_p13 = scmp.eq.s32.totalorder %s543_s11, 1  ;;  %p544_p1 = scmp.ge.s32.totalorder %s832_s18, 1 }
  0x35   : > { %p970_p2 = por %p1216_p3, %p65_p0  ;;  %p1232_p4 = scmp.ne.s32.totalorder %s828_s17, %s824_s16 }
  0x36   : > { %p981_p7 = por %p147_p13, %p65_p0  ;;  %p154_p9 = scmp.lt.s32.totalorder %s832_s18, 3 }
  0x37   : > { %s1231_s12 = scalar_select %p970_p2, 1, 0 }
  0x38   : > { %p977_p5 = por %p141_p10, %p1232_p4  ;;  %p986_p11 = pnand %p544_p1, %p154_p9 }
  0x39   : > { %s1234_s6 = scalar_select %p981_p7, 1, 0 }
  0x3a   : > { %s1233_s30 = scalar_select %p977_p5, 1, 0 }
  0x3b   : > { %s1235_s13 = scalar_select %p986_p11, 1, 0 }
  0x3c   : > { %s1236_s1 = sld [smem:[#allocation19_spill]]  ;;  %p587_p12 = pneg %p986_p11 }
  0x3d   : > { %s180_s27 = scalar_lea.vmem [#allocation6], %s907_s24  ;;  %s1011_s20 = scalar_lea.hbm %s1204_s3, %s910_s25 }
  0x3e   : > { %s186_s28 = sshll.u32 %s180_s27, 4  ;;  %p1003_p0 = pnand %p587_p12, %p1216_p3  ;;  %s999_s28 = int_to_ptr.vmem [resolvable:$true] %s186_s28 }
  0x3f   : > { %s1015_s5 = scalar_lea.sflag [#allocation3], %s176_s23 }
  0x40   : > { %s1237_s11 = scalar_select %p1003_p0, 1, 0 }
  0x42   : > { %s994_s21 = scalar_lea.hbm %s1236_s1, %s910_s25  ;;  %s690_s22 = scalar_lea.hbm %s1236_s1, 4096 }
  0x43   : > { %s685_s8 = scalar_lea.hbm %s994_s21, 512  ;;  %p691_p4 = scmp.lt.u32.totalorder %s994_s21, %s1236_s1 }
  0x44   : > { %p686_p10 = scmp.ne.s32.totalorder %s994_s21, %s685_s8  ;;  %p692_p9 = scmp.lt.u32.totalorder %s690_s22, %s685_s8 }
  0x45   : > { %p694_p3 = scmp.lt.u32.totalorder %s685_s8, %s994_s21 }
  0x46   : > { %p688_p13 = pnand %p686_p10, %p932_p8  ;;  %p693_p12 = por %p692_p9, %p691_p4 }
  0x48   : > { %p689_p1 = pneg %p688_p13  ;;  %p695_p7 = por %p694_p3, %p693_p12 }
  0x4a   : > { %p696_p5 = pnand %p695_p7, %p689_p1 }
  0x4c   : > { %699 = shalt.err (!%p696_p5)
}
  0x4d   : > { %s700_s23 = scalar_lea.vmem %s999_s28, 512  ;;  %s838_s2 = smov [#allocation6]  }
  0x4e   : > { %p701_p10 = scmp.ne.s32.totalorder %s999_s28, %s700_s23  ;;  %s705_s25 = sshll.u32 %s838_s2, 4  ;;  %s706_s25 = int_to_ptr.vmem [resolvable:$false] %s705_s25 }
  0x4f   : > { %s707_s18 = scalar_lea.vmem %s706_s25, 1024  ;;  %p708_p11 = scmp.lt.s32.totalorder %s999_s28, %s706_s25 }
  0x50   : > { %p703_p13 = pnand %p701_p10, %p932_p8  ;;  %p709_p0 = scmp.lt.s32.totalorder %s707_s18, %s700_s23 }
  0x52   : > { %p704_p2 = pneg %p703_p13  ;;  %p710_p4 = por %p709_p0, %p708_p11 }
  0x54   : > { %p711_p9 = pnand %p710_p4, %p704_p2 }
  0x56   : > { %714 = shalt.err (!%p711_p9)
}
  0x57   : > { %s1238_s19 = smov 8   ;;  %s1239_s22 = smov 128  }
  0x58   : > { %s1240_s29 = smov 256   ;;  %s220_s8 = scalar_lea.vmem [#allocation9], %s907_s24 }
  0x59   : > { %594 = dma.hbm_to_vmem [thread:$0]  (!%p912_p6), %s994_s21, 512, %s999_s28, %s1015_s5, %s1240_s29, %s1239_s22, %s1238_s19  }
  0x5a   : > { %s226_s14 = sshll.u32 %s220_s8, 4  ;;  %s715_s23 = scalar_lea.hbm %s1201_s0, 16  ;;  %s1059_s14 = int_to_ptr.vmem [resolvable:$true] %s226_s14 }
  0x5b   : > { %p716_p3 = scmp.ne.s32.totalorder %s1201_s0, %s715_s23  ;;  %p1241_p2 = scmp.ne.s32.totalorder %s1237_s11, 0 }
  0x5c   : > { %p722_p0 = scmp.lt.u32.totalorder %s715_s23, %s1201_s0 }
  0x5d   : > { %p717_p5 = pneg %p1241_p2 }
  0x5f   : > { %p718_p7 = pnand %p717_p5, %p716_p3 }
  0x61   : > { %p719_p11 = pneg %p718_p7 }
  0x63   : > { %p724_p1 = pnand %p722_p0, %p719_p11 }
  0x65   : > { %727 = shalt.err (!%p724_p1)
}
  0x66   : > { %s839_s24 = smov [#allocation2]   ;;  %s728_s28 = scalar_lea.hbm %s1011_s20, 512 }
  0x67   : > { %590 = dma.hbm_to_smem (!%p1241_p2), %s1201_s0, 16, %s839_s24, [#allocation5]  }
  0x68   : > { %p729_p12 = scmp.ne.s32.totalorder %s1011_s20, %s728_s28  ;;  %s733_s11 = scalar_lea.hbm %s1204_s3, 1024 }
  0x69   : > { %p734_p4 = scmp.lt.u32.totalorder %s1011_s20, %s1204_s3  ;;  %p735_p9 = scmp.lt.u32.totalorder %s733_s11, %s728_s28 }
  0x6a   : > { %p731_p10 = pnand %p729_p12, %p932_p8  ;;  %p737_p5 = scmp.lt.u32.totalorder %s728_s28, %s1011_s20 }
  0x6b   : > { %p736_p3 = por %p735_p9, %p734_p4 }
  0x6c   : > { %p732_p13 = pneg %p731_p10 }
  0x6d   : > { %p738_p7 = por %p737_p5, %p736_p3 }
  0x6f   : > { %p739_p2 = pnand %p738_p7, %p732_p13 }
  0x71   : > { %742 = shalt.err (!%p739_p2)
}
  0x72   : > { %s743_s2 = scalar_lea.vmem %s1059_s14, 512  ;;  %s840_s23 = smov [#allocation9]  }
  0x73   : > { %p744_p11 = scmp.ne.s32.totalorder %s1059_s14, %s743_s2  ;;  %s748_s25 = sshll.u32 %s840_s23, 4  ;;  %s749_s25 = int_to_ptr.vmem [resolvable:$false] %s748_s25 }
  0x74   : > { %s750_s18 = scalar_lea.vmem %s749_s25, 1024  ;;  %p751_p12 = scmp.lt.s32.totalorder %s1059_s14, %s749_s25 }
  0x75   : > { %p746_p0 = pnand %p744_p11, %p932_p8  ;;  %p752_p10 = scmp.lt.s32.totalorder %s750_s18, %s743_s2 }
  0x77   : > { %p747_p1 = pneg %p746_p0  ;;  %p753_p4 = por %p752_p10, %p751_p12 }
  0x79   : > { %p754_p9 = pnand %p753_p4, %p747_p1 }
  0x7b   : > { %757 = shalt.err (!%p754_p9)
}
  0x7c   : > { %600 = dma.hbm_to_vmem [thread:$0]  (!%p912_p6), %s1011_s20, 512, %s1059_s14, %s926_s7, %s1240_s29, %s1239_s22, %s1238_s19  }
  0x7d   : > { %p1242_p8 = scmp.ne.s32.totalorder %s1235_s13, 0 }
  0x7e   : > { %p1243_p13 = scmp.eq.s32.totalorder (!%p1242_p8), %s960_s10, 0 }
  0x7f   : > { %238 = sbr.rel (%p1242_p8) target bundleno = 204 (0xcc), region = 36 }
  0x86   : > { %803 = dma.done.wait (%p1243_p13), [#allocation5], 16   ;;  %p1244_p3 = pmov %p1243_p13 }
  0x87   : > { %s1093_s9 = sand.u32 1, %s824_s16   ;;  %p1245_p5 = scmp.ne.s32.totalorder %s1231_s12, 0 }
  0x88   : > { %805 = vsyncadd (%p1244_p3), [#allocation5], 4294967280  ;;  %s555_s26 = sshll.u32 %s1093_s9, 5  ;;  %s245_s24 = scalar_lea.sflag [#allocation3], %s1093_s9 }
  0x89   : > { %s248_s5 = scalar_lea.vmem [#allocation6], %s555_s26 }
  0x8a   : > { %807 = dma.done.wait (%p1245_p5), %s245_s24, 512  }
  0x8b   : > { %809 = vsyncadd (%p1245_p5), %s245_s24, 4294966784  ;;  %s253_s7 = sand.u32 1, %s960_s10   ;;  %s1102_s20 = scalar_lea.vmem [#allocation7], %s555_s26 }
  0x8c   : > { %s254_s13 = scalar_lea.sflag [#allocation8], %s253_s7 }
  0x8d   : > { %811 = dma.done.wait (%p1245_p5), %s254_s13, 1024  }
  0x8e   : > { %813 = vsyncadd (%p1245_p5), %s254_s13, 4294966272  ;;  %s1108_s19 = scalar_lea.vmem [#allocation9], %s555_s26 }
  0x8f   : > { %271 = sfence }
  0x90   : > { %v302_v0 = vld [vmem:[%s248_s5] sm:$0xff]  ;;  %v559_v1 = vld [vmem:[%s248_s5 + $0x8] sm:$0xff]  ;;  %v560_v2 = vld [vmem:[%s248_s5 + $0x10] sm:$0xff]  ;;  %s1122_s12 = sld [smem:[#allocation2]]  ;;  %s1124_s22 = sld [smem:[#allocation2 + $0x1]] }
  0x91   : > { %v305_v3 = vmax.f32 %v302_v0, %v559_v1  ;;  %v561_v4 = vld [vmem:[%s248_s5 + $0x18] sm:$0xff]  ;;  %v316_v12 = vld [vmem:[%s1102_s20] sm:$0xff]  ;;  %v562_v13 = vld [vmem:[%s1102_s20 + $0x8] sm:$0xff]  ;;  %s1129_s29 = sld [smem:[#allocation2 + $0x2]]  ;;  %s1136_s14 = sld [smem:[#allocation2 + $0x3]] }
  0x92   : > { %vm317_vm0 = vcmp.eq.s32.totalorder %v316_v12, 0  ;;  %vm320_vm1 = vcmp.eq.s32.totalorder %v562_v13, 0  ;;  %v563_v17 = vld [vmem:[%s1102_s20 + $0x10] sm:$0xff]  ;;  %vm342_vm2 = vcmp.eq.s32.totalorder %v316_v12, 1  ;;  %vm343_vm3 = vcmp.eq.s32.totalorder %v562_v13, 1  ;;  %v564_v18 = vld [vmem:[%s1102_s20 + $0x18] sm:$0xff] }
  0x93   : > { %v308_v5 = vmax.f32 %v305_v3, %v560_v2  ;;  %vm321_vm4 = vmor %vm317_vm0, %vm320_vm1  ;;  %vm324_vm5 = vcmp.eq.s32.totalorder %v563_v17, 0  ;;  %vm345_vm7 = vcmp.eq.s32.totalorder %v563_v17, 1  ;;  %vm362_vm8 = vcmp.eq.s32.totalorder %v316_v12, 2  ;;  %v331_v19 = vld [vmem:[%s1108_s19] sm:$0xff]  ;;  %v566_v21 = vld [vmem:[%s1108_s19 + $0x8] sm:$0xff]  ;;  %s558_s21 = sshll.u32 %s1093_s9, 3 }
  0x94   : > { %vm344_vm6 = vmor %vm342_vm2, %vm343_vm3  ;;  %vm363_vm9 = vcmp.eq.s32.totalorder %v562_v13, 2  ;;  %vm328_vm11 = vcmp.eq.s32.totalorder %v564_v18, 0  ;;  %vm347_vm13 = vcmp.eq.s32.totalorder %v564_v18, 1  ;;  %vm365_vm15 = vcmp.eq.s32.totalorder %v563_v17, 2  ;;  %v568_v28 = vld [vmem:[%s1108_s19 + $0x10] sm:$0xff]  ;;  %v570_v37 = vld [vmem:[%s1108_s19 + $0x18] sm:$0xff] }
  0x95   : > { %v311_v6 = vmax.f32 %v308_v5, %v561_v4  ;;  %vm325_vm10 = vmor %vm321_vm4, %vm324_vm5  ;;  %vm382_vm1 = vcmp.eq.s32.totalorder %v316_v12, 3  ;;  %vm383_vm2 = vcmp.eq.s32.totalorder %v562_v13, 3  ;;  %vm367_vm5 = vcmp.eq.s32.totalorder %v564_v18, 2  ;;  %s301_s28 = scalar_lea.vmem [#allocation10], %s558_s21  ;;  %s572_s17 = sshll.u32 %s960_s10, 7 }
  0x96   : > { %v332_v20 = vstv %s1122_s12  ;;  %v352_v22 = vstv %s1124_s22  ;;  %vm346_vm12 = vmor %vm344_vm6, %vm345_vm7  ;;  %vm385_vm7 = vcmp.eq.s32.totalorder %v563_v17, 3  ;;  %s418_s1 = sshll.u32 %s301_s28, 4  ;;  %s1159_s27 = scalar_lea.hbm %s1205_s4, %s572_s17  ;;  %s1154_s1 = int_to_ptr.vmem [resolvable:$true] %s418_s1 }
  0x97   : > { %v1110_v7 = vsub.f32 %v302_v0, %v311_v6  ;;  %v1112_v8 = vsub.f32 %v559_v1, %v311_v6  ;;  %v1114_v9 = vsub.f32 %v560_v2, %v311_v6  ;;  %v1116_v10 = vsub.f32 %v561_v4, %v311_v6  ;;  %vm364_vm14 = vmor %vm362_vm8, %vm363_vm9  ;;  %s405_s2 = scalar_lea.sflag [#allocation4], %s1093_s9  ;;  %s758_s23 = scalar_lea.vmem %s1154_s1, 128 }
  0x98   : > { %vm1138_vm0 = vmor %vm325_vm10, %vm328_vm11  ;;  %v333_v25 = vmul.f32 %v332_v20, %v331_v19  ;;  %v353_v26 = vmul.f32 %v566_v21, %v352_v22  ;;  %v372_v29 = vstv %s1129_s29  ;;  %v392_v38 = vstv %s1136_s14  ;;  %p759_p6 = scmp.ne.s32.totalorder %s1154_s1, %s758_s23  ;;  %p1248_p7 = scmp.ne.s32.totalorder %s1233_s30, 0 }
  0x99   : > { %v313_v11 = vmul.f32 1.442695, %v1110_v7  ;;  %v339_v14 = vmul.f32 1.442695, %v1112_v8  ;;  %v359_v15 = vmul.f32 1.442695, %v1114_v9  ;;  %vm348_vm3 = vmor %vm346_vm12, %vm347_vm13  ;;  %v373_v36 = vmul.f32 %v568_v28, %v372_v29 }
  0x9a   : > { %v379_v16 = vmul.f32 1.442695, %v1116_v10  ;;  %vm366_vm4 = vmor %vm364_vm14, %vm365_vm15  ;;  %v334_v33 = vsel %vm1138_vm0, %v333_v25, 0.0  ;;  %v354_v34 = vsel %vm348_vm3, %v353_v26, 0.0  ;;  %vm387_vm10 = vcmp.eq.s32.totalorder %v564_v18, 3  ;;  %p760_p2 = pnand %p759_p6, %p1248_p7  ;;  %s841_s10 = smov [#allocation10]  }
  0x9b   : > { %645 = vpow2.f32 %v313_v11  ;;  %vm384_vm6 = vmor %vm382_vm1, %vm383_vm2  ;;  %v335_v40 = vmul.f32 %v334_v33, %v1110_v7  ;;  %v355_v41 = vmul.f32 %v354_v34, %v1112_v8  ;;  %v393_v43 = vmul.f32 %v570_v37, %v392_v38  ;;  %s762_s25 = sshll.u32 %s841_s10, 4  ;;  %s763_s25 = int_to_ptr.vmem [resolvable:$false] %s762_s25 }
  0x9c   : > { %647 = vpow2.f32 %v339_v14  ;;  %vm368_vm8 = vmor %vm366_vm4, %vm367_vm5  ;;  %v357_v44 = vadd.f32 %v354_v34, %v334_v33  ;;  %p761_p11 = pneg %p760_p2  ;;  %s764_s18 = scalar_lea.vmem %s763_s25, 256 }
  0x9d   : > { %649 = vpow2.f32 %v359_v15  ;;  %vm386_vm9 = vmor %vm384_vm6, %vm385_vm7  ;;  %v374_v42 = vsel %vm368_vm8, %v373_v36, 0.0  ;;  %v356_v45 = vadd.f32 %v355_v41, %v335_v40  ;;  %p765_p0 = scmp.lt.s32.totalorder %s1154_s1, %s763_s25  ;;  %p766_p1 = scmp.lt.s32.totalorder %s764_s18, %s758_s23 }
  0x9e   : > { %651 = vpow2.f32 %v379_v16  ;;  %vm388_vm11 = vmor %vm386_vm9, %vm387_vm10  ;;  %v375_v46 = vmul.f32 %v374_v42, %v1114_v9  ;;  %v377_v48 = vadd.f32 %v374_v42, %v357_v44 }
  0x9f   : > { %v394_v47 = vsel %vm388_vm11, %v393_v43, 0.0  ;;  %p767_p12 = por %p766_p1, %p765_p0 }
  0xa0   : > { %v376_v49 = vadd.f32 %v375_v46, %v356_v45  ;;  %v395_v50 = vmul.f32 %v394_v47, %v1116_v10  ;;  %v397_v51 = vadd.f32 %v394_v47, %v377_v48 }
  0xa1   : > { %p768_p10 = pnand %p767_p12, %p761_p11 }
  0xa2   : > { %v396_v53 = vadd.f32 %v395_v50, %v376_v49 }
  0xa5   : > { %v646_v23 = vpop.eup %645 }
  0xa6   : > { %v648_v27 = vpop.eup %647 }
  0xa7   : > { %v650_v30 = vpop.eup %649  ;;  %v341_v31 = vadd.f32 %v648_v27, %v646_v23 }
  0xa8   : > { %v652_v32 = vpop.eup %651 }
  0xa9   : > { %v361_v35 = vadd.f32 %v650_v30, %v341_v31 }
  0xab   : > { %v381_v39 = vadd.f32 %v652_v32, %v361_v35 }
  0xad   : > { %653 = vlog2.f32 %v381_v39 }
  0xb7   : > { %v654_v52 = vpop.eup %653 }
  0xb8   : > { %v399_v54 = vmul.f32 0.6931472, %v654_v52 }
  0xba   : > { %v400_v55 = vmul.f32 %v399_v54, %v397_v51 }
  0xbc   : > { %v401_v56 = vsub.f32 %v396_v53, %v400_v55 }
  0xbe   : > { %403 = vst [vmem:[%s301_s28] sm:$0xff] %v401_v56 }
  0xbf   : > { %771 = shalt.err (!%p768_p10)
}
  0xc0   : > { %s772_s9 = scalar_lea.hbm %s1159_s27, 128  ;;  %s776_s5 = scalar_lea.hbm %s1205_s4, 256 }
  0xc1   : > { %p773_p4 = scmp.ne.s32.totalorder %s1159_s27, %s772_s9  ;;  %p777_p13 = scmp.lt.u32.totalorder %s1159_s27, %s1205_s4 }
  0xc2   : > { %p778_p3 = scmp.lt.u32.totalorder %s776_s5, %s772_s9  ;;  %p780_p6 = scmp.lt.u32.totalorder %s772_s9, %s1159_s27 }
  0xc3   : > { %p774_p9 = pnand %p773_p4, %p1248_p7 }
  0xc4   : > { %p779_p5 = por %p778_p3, %p777_p13 }
  0xc5   : > { %p775_p8 = pneg %p774_p9 }
  0xc6   : > { %p781_p2 = por %p780_p6, %p779_p5 }
  0xc8   : > { %p782_p11 = pnand %p781_p2, %p775_p8 }
  0xca   : > { %785 = shalt.err (!%p782_p11)
}
  0xcb   : > { %585 = dma.vmem_to_hbm [thread:$0]  (%p1248_p7), %s1154_s1, 128, %s1159_s27, %s405_s2  }
  0xcc PF: > { %s1249_s20 = sld [smem:[#allocation16_spill]]  ;;  %s430_s19 = sand.u32 1, %s820_s15  }
  0xcd   : > { %p1250_p0 = scmp.ne.s32.totalorder %s1234_s6, 0  ;;  %s431_s12 = scalar_lea.sflag [#allocation4], %s430_s19 }
  0xd2   : > { %p1251_p1 = scmp.ge.s32.totalorder %s1249_s20, 2 }
  0xd4   : > { %p602_p12 = pnand %p1251_p1, %p1250_p0 }
  0xd6   : > { %815 = dma.done.wait (!%p602_p12), %s431_s12, 128  }
  0xd7   : > { %817 = vsyncadd (!%p602_p12), %s431_s12, 4294967168  ;;  %s1252_s18 = sld [smem:[#allocation17_spill]]  ;;  %s1253_s22 = sld [smem:[#allocation15_spill]] }
  0xd8   : > { %s1254_s17 = sld [smem:[#allocation18_spill]]  ;;  %s1255_s15 = smov %s824_s16 }
  0xdd   : > { %p21_p10 = scmp.ge.s32.totalorder %s1252_s18, 4   ;;  %s1256_s16 = smov %s1253_s22 }
  0xdf   :  { %23 = sbr.rel (!%p21_p10) target bundleno = 11 (0xb), region = 119 }
  0xe6   :  { %436 = vsyncpa [#allocation3], 1 }
  0xe7   :  { %438 = vsyncpa [#allocation3 + $0x1], 1 }
  0xe8   :  { %439 = vsyncpa [#allocation8], 1 }
  0xe9   :  { %441 = vsyncpa [#allocation8 + $0x1], 1 }
  0xea   :  { %442 = vsyncpa [#allocation4], 1 }
  0xeb   :  { %444 = vsyncpa [#allocation4 + $0x1], 1 }
  0xec   :  { %445 = vsyncpa [#allocation5], 1 }
  0xed   :  { %447 = vsyncpa [#allocation5 + $0x1], 1 }

</bundles_post_ra>
